<compile_context>
chip_gen: v7x
topology: tpu7x:2x2x1
jax: 0.10.0
libtpu: 0.0.40
codegen_flags: <defaults>
</compile_context>

<pallas_src>
import functools

import jax
import jax.numpy as jnp
from jax.experimental import pallas as pl
from jax.experimental.pallas import tpu as pltpu


def _vmem_capacity_bytes():
    try:
        v = int(pltpu.get_tpu_info().vmem_capacity_bytes)
        if v > 0:
            return v
    except Exception:
        pass
    return 64 * 1024 * 1024  # conservative fallback: v7x per-TensorCore VMEM


def _num_tensorcores():
    try:
        d = jax.devices()[0]
        n = getattr(d, "num_cores", None) or getattr(d, "core_count", None)
        if n:
            return max(1, int(n))
    except Exception:
        pass
    return 1


def _apc_loss_kernel(x_ref, h_ref, w_ref, b_ref, out_ref, acc_ref, *,
                     valid_t, tiles_per_chunk):
    c = pl.program_id(0)            # chunk index (parallel across TensorCores)
    t = pl.program_id(1)            # time-tile index inside chunk (reduction)
    gt = c * tiles_per_chunk + t    # UNCLAMPED global time-tile index

    batch, tm_t, din = x_ref.shape

    @pl.when(t == 0)
    def _():
        acc_ref[...] = jnp.zeros_like(acc_ref)

    # Frames with global time >= valid_t are invalid:
    #   * the last num_pred_steps frames of every sequence,
    #   * garbage rows of a partial trailing tile (time >= T),
    #   * phantom tiles of the last chunk (the index map clamps the DMA index;
    #     the UNCLAMPED gt here pushes `time` past valid_t so they contribute 0).
    time = jax.lax.broadcasted_iota(jnp.int32, (tm_t, din), 0) + gt * tm_t
    tmask = time < valid_t

    w = w_ref[...]                  # (H, Din) bf16, resident across the grid
    bias = b_ref[...]               # (1, Din) f32

    # Static loop over the (small) batch dim: `batch` separate (tm_t, H)@(H, Din)
    # MXU calls.  The kernel is HBM-bound, so the per-dot overhead is hidden.
    for b in range(batch):
        hb = h_ref[b].astype(jnp.bfloat16)      # in-kernel cast: no extra HBM pass
        y = jnp.dot(hb, w, preferred_element_type=jnp.float32) + bias
        d = jnp.abs(x_ref[b] - y)               # f32 elementwise
        # where(..., 0.0) (not multiply-by-mask) so NaN/Inf from garbage rows
        # read past the valid region cannot leak into the sum.
        acc_ref[...] = acc_ref[...] + jnp.where(tmask, d, 0.0)

    # One cross-lane/sublane reduction per chunk; lane-dense (1, 128) out block.
    @pl.when(t == pl.num_programs(1) - 1)
    def _():
        out_ref[...] = jnp.full((1, 128), jnp.sum(acc_ref[...]), dtype=jnp.float32)


@functools.partial(jax.jit, static_argnames=("num_pred_steps",))
def apc_predictor_loss(x, h, W, b, *, num_pred_steps):
    """L1-sum loss of APCPredictor.

    x: (B, T, input_dim) f32
    h: (B, T, hidden_dim) f32  (streamed to the MXU as bf16 inside the kernel)
    W: (input_dim, hidden_dim) f32   (PyTorch nn.Linear weight layout)
    b: (input_dim,) f32
    """
    B, T, input_dim = x.shape
    hidden_dim = h.shape[-1]
    p = int(num_pred_steps)
    valid_t = T - p
    if valid_t <= 0:          # empty prediction window -> empty l1 sum
        return jnp.zeros((), jnp.float32)

    # ---- operand prep: NO pass over h --------------------------------------
    if p == 0:
        x_s = x.astype(jnp.float32)                         # no copy if already f32
    else:
        # Shift the small tensor once: x_s[:, t] = x[:, t + p]; the zero tail
        # (and any trailing-tile garbage) is masked in-kernel.
        x_s = jnp.concatenate(
            [x[:, p:].astype(jnp.float32),
             jnp.zeros((B, p, input_dim), jnp.float32)], axis=1)
    w_t = W.T.astype(jnp.bfloat16)                          # (H, Din), tiny, resident
    b2 = b.reshape(1, input_dim).astype(jnp.float32)

    # ---- hardware-derived tile sizing ---------------------------------------
    h_bytes = jnp.dtype(h.dtype).itemsize
    vmem_cap = _vmem_capacity_bytes()
    # Per (batch, time) row: double-buffered h + x, accumulator share, plus slack
    # for the in-kernel bf16 copy of h and the y / |diff| temporaries.
    per_row_vmem = (2 * hidden_dim * h_bytes + 2 * 4 * input_dim
                    + 4 * input_dim + 2 * hidden_dim + 12 * input_dim)
    per_row_hbm = hidden_dim * h_bytes + 4 * input_dim
    rows_budget = max(8, int(vmem_cap * 0.55) // per_row_vmem)
    rows_target = max(1024, (12 << 20) // per_row_hbm)      # ~12 MiB streamed / step
    rows = min(rows_budget, rows_target)                    # rows = B * tm_t target

    if B * T <= rows or T <= 8:
        tm_t = T                                            # single time tile (legal: full dim)
    else:
        tm_t = max(8, (min(T, rows // B) // 8) * 8)         # 8-aligned time tile
    n_tt = pl.cdiv(valid_t, tm_t)                           # tiles covering the valid frames

    n_chunks = max(1, min(_num_tensorcores(), n_tt))        # 1 on v5e/v6e, >1 on dual-TC parts
    tpc = pl.cdiv(n_tt, n_chunks)

    def xh_map(c, t):
        # Clamp phantom tiles of the last chunk to a real tile; their frames are
        # fully masked in-kernel via the UNCLAMPED tile index (see kernel).
        return (0, jnp.minimum(c * tpc + t, n_tt - 1), 0)

    kernel = functools.partial(_apc_loss_kernel, valid_t=valid_t,
                               tiles_per_chunk=tpc)

    flops = 2 * B * T * hidden_dim * input_dim
    bytes_accessed = int(B * T * (hidden_dim * h_bytes + 4 * input_dim)
                         + hidden_dim * input_dim * 2 + 4 * input_dim
                         + n_chunks * 128 * 4)

    vmem_needed = (2 * B * tm_t * (hidden_dim * h_bytes + 4 * input_dim)
                   + tm_t * (4 * input_dim + 2 * hidden_dim + 12 * input_dim)
                   + 2 * (hidden_dim * input_dim * 2 + 4 * input_dim)
                   + n_chunks * 1024)
    vmem_limit = int(min(0.9 * vmem_cap, vmem_needed + (16 << 20)))

    partials = pl.pallas_call(
        kernel,
        out_shape=jax.ShapeDtypeStruct((1, n_chunks * 128), jnp.float32),
        grid_spec=pltpu.PrefetchScalarGridSpec(
            num_scalar_prefetch=0,
            grid=(n_chunks, tpc),
            in_specs=[
                pl.BlockSpec((B, tm_t, input_dim), xh_map),                  # shifted x (f32)
                pl.BlockSpec((B, tm_t, hidden_dim), xh_map),                 # h, producer dtype
                pl.BlockSpec((hidden_dim, input_dim), lambda c, t: (0, 0)),  # W^T (bf16) resident
                pl.BlockSpec((1, input_dim), lambda c, t: (0, 0)),           # bias resident
            ],
            out_specs=pl.BlockSpec((1, 128), lambda c, t: (0, c)),           # per-chunk sum
            scratch_shapes=[pltpu.VMEM((tm_t, input_dim), jnp.float32)],     # vector accumulator
        ),
        compiler_params=pltpu.CompilerParams(
            dimension_semantics=("parallel", "arbitrary"),
            vmem_limit_bytes=vmem_limit,
        ),
        cost_estimate=pl.CostEstimate(flops=flops, transcendentals=0,
                                      bytes_accessed=bytes_accessed),
    )(x_s, h, w_t, b2)

    # Each chunk wrote its scalar broadcast across its 128-lane block; take lane 0.
    return jnp.sum(partials.reshape(n_chunks, 128)[:, 0])


if __name__ == "__main__":
    # Small shapes consistent with the module.
    B, T = 2, 8
    hidden_dim, input_dim = 32, 16
    num_pred_steps = 2

    key = jax.random.PRNGKey(0)
    kx, kh, kw, kb = jax.random.split(key, 4)

    x = jax.random.normal(kx, (B, T, input_dim), dtype=jnp.float32)
    h = jax.random.normal(kh, (B, T, hidden_dim), dtype=jnp.float32)

    # Deterministic nn.Linear-style init: U(-1/sqrt(hidden_dim), 1/sqrt(hidden_dim)).
    bound = 1.0 / (hidden_dim ** 0.5)
    W = jax.random.uniform(kw, (input_dim, hidden_dim), jnp.float32, -bound, bound)
    b = jax.random.uniform(kb, (input_dim,), jnp.float32, -bound, bound)

    loss = apc_predictor_loss(x, h, W, b, num_pred_steps=num_pred_steps)
    loss = jax.block_until_ready(loss)

    # Pure-JAX f32 reference (kernel streams h/W to the MXU as bf16 -> loose tol).
    y_ref = jnp.einsum("btk,dk->btd", h, W) + b
    ref = jnp.sum(jnp.abs(x[:, num_pred_steps:] - y_ref[:, :-num_pred_steps]))
    assert jnp.allclose(loss, ref, rtol=2e-2, atol=1e-2), (loss, ref)

    # Also exercise the num_pred_steps == 0 path.
    loss0 = apc_predictor_loss(x, h, W, b, num_pred_steps=0)
    loss0 = jax.block_until_ready(loss0)
    ref0 = jnp.sum(jnp.abs(x - y_ref))
    assert jnp.allclose(loss0, ref0, rtol=2e-2, atol=1e-2), (loss0, ref0)

    print("KERNEL_OK")
</pallas_src>

<mosaic_0001>
module attributes {stable_mosaic.version = 11 : i64} {
  func.func @_apc_loss_kernel(%arg0: i32, %arg1: i32, %arg2: memref<2x8x16xf32, #tpu.memory_space<vmem>>, %arg3: memref<2x8x32xf32, #tpu.memory_space<vmem>>, %arg4: memref<32x16xbf16, #tpu.memory_space<vmem>>, %arg5: memref<1x16xf32, #tpu.memory_space<vmem>>, %arg6: memref<1x128xf32, #tpu.memory_space<vmem>>, %arg7: memref<8x16xf32, #tpu.memory_space<vmem>>) attributes {dimension_semantics = [#tpu.dimension_semantics<parallel>, #tpu.dimension_semantics<arbitrary>], iteration_bounds = array<i64: 1, 1>, scalar_prefetch = 0 : i64, scratch_operands = 1 : i64, tpu.core_type = #tpu.core_type<tc>, window_params = [{transform_indices = @transform_0, window_bounds = array<i64: 2, 8, 16>}, {transform_indices = @transform_1, window_bounds = array<i64: 2, 8, 32>}, {pipeline_mode = #tpu.pipeline_mode<synchronous>, transform_indices = @transform_2, window_bounds = array<i64: 32, 16>}, {pipeline_mode = #tpu.pipeline_mode<synchronous>, transform_indices = @transform_3, window_bounds = array<i64: 1, 16>}, {transform_indices = @transform_4, window_bounds = array<i64: 1, 128>}]} {
    %c1_i32 = arith.constant 1 : i32
    %0 = arith.muli %arg0, %c1_i32 : i32
    %1 = arith.addi %0, %arg1 : i32
    %c0_i32 = arith.constant 0 : i32
    %2 = arith.cmpi eq, %arg1, %c0_i32 : i32
    %3 = arith.extui %2 : i1 to i32
    %c0_i32_0 = arith.constant 0 : i32
    %4 = arith.cmpi ne, %3, %c0_i32_0 : i32
    scf.if %4 {
      %cst_28 = arith.constant 0.000000e+00 : f32
      %46 = vector.broadcast %cst_28 : f32 to vector<8x16xf32>
      %c0_29 = arith.constant 0 : index
      %c0_30 = arith.constant 0 : index
      %47 = vector.load %arg7[%c0_29, %c0_30] : memref<8x16xf32, #tpu.memory_space<vmem>>, vector<8x16xf32>
      tpu.vector_store %arg7[%c0_29, %c0_30], %46 {strides = array<i32>} : memref<8x16xf32, #tpu.memory_space<vmem>>, vector<8x16xf32>,
    } else {
    }
    %5 = tpu.iota {dimensions = array<i32: 0>} : vector<8x16xi32>
    %c8_i32 = arith.constant 8 : i32
    %6 = arith.muli %1, %c8_i32 : i32
    %7 = vector.broadcast %6 : i32 to vector<8x16xi32>
    %8 = arith.addi %5, %7 : vector<8x16xi32>
    %c6_i32 = arith.constant 6 : i32
    %9 = vector.broadcast %c6_i32 : i32 to vector<8x16xi32>
    %10 = arith.cmpi slt, %8, %9 : vector<8x16xi32>
    %c0 = arith.constant 0 : index
    %c0_1 = arith.constant 0 : index
    %11 = vector.load %arg4[%c0, %c0_1] : memref<32x16xbf16, #tpu.memory_space<vmem>>, vector<32x16xbf16>
    %c0_2 = arith.constant 0 : index
    %c0_3 = arith.constant 0 : index
    %12 = vector.load %arg5[%c0_2, %c0_3] : memref<1x16xf32, #tpu.memory_space<vmem>>, vector<1x16xf32>
    %c0_4 = arith.constant 0 : index
    %c0_5 = arith.constant 0 : index
    %c0_6 = arith.constant 0 : index
    %13 = vector.load %arg3[%c0_4, %c0_5, %c0_6] : memref<2x8x32xf32, #tpu.memory_space<vmem>>, vector<1x8x32xf32>
    %14 = vector.shape_cast %13 : vector<1x8x32xf32> to vector<8x32xf32>
    %15 = arith.truncf %14 : vector<8x32xf32> to vector<8x32xbf16>
    %cst = arith.constant dense<0.000000e+00> : vector<8x16xf32>
    %16 = tpu.matmul %15, %11, %cst {dimension_numbers = #tpu.dot_dimension_numbers<[1], [0], [0], [1], [0, 0, 1, 1], [], []>} : vector<8x32xbf16>, vector<32x16xbf16>, vector<8x16xf32> -> vector<8x16xf32>
    %17 = vector.broadcast %12 : vector<1x16xf32> to vector<8x16xf32>
    %18 = arith.addf %16, %17 : vector<8x16xf32>
    %c0_7 = arith.constant 0 : index
    %c0_8 = arith.constant 0 : index
    %c0_9 = arith.constant 0 : index
    %19 = vector.load %arg2[%c0_7, %c0_8, %c0_9] : memref<2x8x16xf32, #tpu.memory_space<vmem>>, vector<1x8x16xf32>
    %20 = vector.shape_cast %19 : vector<1x8x16xf32> to vector<8x16xf32>
    %21 = arith.subf %20, %18 : vector<8x16xf32>
    %22 = math.absf %21 : vector<8x16xf32>
    %c0_10 = arith.constant 0 : index
    %c0_11 = arith.constant 0 : index
    %23 = vector.load %arg7[%c0_10, %c0_11] : memref<8x16xf32, #tpu.memory_space<vmem>>, vector<8x16xf32>
    %cst_12 = arith.constant 0.000000e+00 : f32
    %24 = vector.broadcast %cst_12 : f32 to vector<8x16xf32>
    %25 = arith.select %10, %22, %24 : vector<8x16xi1>, vector<8x16xf32>
    %26 = arith.addf %23, %25 : vector<8x16xf32>
    %c0_13 = arith.constant 0 : index
    %c0_14 = arith.constant 0 : index
    %27 = vector.load %arg7[%c0_13, %c0_14] : memref<8x16xf32, #tpu.memory_space<vmem>>, vector<8x16xf32>
    tpu.vector_store %arg7[%c0_13, %c0_14], %26 {strides = array<i32>} : memref<8x16xf32, #tpu.memory_space<vmem>>, vector<8x16xf32>,
    %c1 = arith.constant 1 : index
    %c0_15 = arith.constant 0 : index
    %c0_16 = arith.constant 0 : index
    %28 = vector.load %arg3[%c1, %c0_15, %c0_16] : memref<2x8x32xf32, #tpu.memory_space<vmem>>, vector<1x8x32xf32>
    %29 = vector.shape_cast %28 : vector<1x8x32xf32> to vector<8x32xf32>
    %30 = arith.truncf %29 : vector<8x32xf32> to vector<8x32xbf16>
    %cst_17 = arith.constant dense<0.000000e+00> : vector<8x16xf32>
    %31 = tpu.matmul %30, %11, %cst_17 {dimension_numbers = #tpu.dot_dimension_numbers<[1], [0], [0], [1], [0, 0, 1, 1], [], []>} : vector<8x32xbf16>, vector<32x16xbf16>, vector<8x16xf32> -> vector<8x16xf32>
    %32 = vector.broadcast %12 : vector<1x16xf32> to vector<8x16xf32>
    %33 = arith.addf %31, %32 : vector<8x16xf32>
    %c1_18 = arith.constant 1 : index
    %c0_19 = arith.constant 0 : index
    %c0_20 = arith.constant 0 : index
    %34 = vector.load %arg2[%c1_18, %c0_19, %c0_20] : memref<2x8x16xf32, #tpu.memory_space<vmem>>, vector<1x8x16xf32>
    %35 = vector.shape_cast %34 : vector<1x8x16xf32> to vector<8x16xf32>
    %36 = arith.subf %35, %33 : vector<8x16xf32>
    %37 = math.absf %36 : vector<8x16xf32>
    %c0_21 = arith.constant 0 : index
    %c0_22 = arith.constant 0 : index
    %38 = vector.load %arg7[%c0_21, %c0_22] : memref<8x16xf32, #tpu.memory_space<vmem>>, vector<8x16xf32>
    %cst_23 = arith.constant 0.000000e+00 : f32
    %39 = vector.broadcast %cst_23 : f32 to vector<8x16xf32>
    %40 = arith.select %10, %37, %39 : vector<8x16xi1>, vector<8x16xf32>
    %41 = arith.addf %38, %40 : vector<8x16xf32>
    %c0_24 = arith.constant 0 : index
    %c0_25 = arith.constant 0 : index
    %42 = vector.load %arg7[%c0_24, %c0_25] : memref<8x16xf32, #tpu.memory_space<vmem>>, vector<8x16xf32>
    tpu.vector_store %arg7[%c0_24, %c0_25], %41 {strides = array<i32>} : memref<8x16xf32, #tpu.memory_space<vmem>>, vector<8x16xf32>,
    %c0_i32_26 = arith.constant 0 : i32
    %43 = arith.cmpi eq, %arg1, %c0_i32_26 : i32
    %44 = arith.extui %43 : i1 to i32
    %c0_i32_27 = arith.constant 0 : i32
    %45 = arith.cmpi ne, %44, %c0_i32_27 : i32
    scf.if %45 {
      %c0_28 = arith.constant 0 : index
      %c0_29 = arith.constant 0 : index
      %46 = vector.load %arg7[%c0_28, %c0_29] : memref<8x16xf32, #tpu.memory_space<vmem>>, vector<8x16xf32>
      %47 = vector.shape_cast %46 : vector<8x16xf32> to vector<1x8x16xf32>
      %cst_30 = arith.constant dense<0.000000e+00> : vector<1xf32>
      %48 = vector.multi_reduction <add>, %47, %cst_30 [1, 2] : vector<1x8x16xf32> to vector<1xf32>
      %49 = vector.shape_cast %48 : vector<1xf32> to vector<1x1x1xf32>
      %50 = vector.extract %49[0, 0, 0] : f32 from vector<1x1x1xf32>
      %51 = vector.broadcast %50 : f32 to vector<1x128xf32>
      %c0_31 = arith.constant 0 : index
      %c0_32 = arith.constant 0 : index
      %52 = vector.load %arg6[%c0_31, %c0_32] : memref<1x128xf32, #tpu.memory_space<vmem>>, vector<1x128xf32>
      tpu.vector_store %arg6[%c0_31, %c0_32], %51 {strides = array<i32>} : memref<1x128xf32, #tpu.memory_space<vmem>>, vector<1x128xf32>,
    } else {
    }
    return
  }
  func.func @transform_0(%arg0: i32, %arg1: i32) -> (i32, i32, i32) {
    %c1_i32 = arith.constant 1 : i32
    %0 = arith.muli %arg0, %c1_i32 : i32
    %1 = arith.addi %0, %arg1 : i32
    %c0_i32 = arith.constant 0 : i32
    %2 = arith.minsi %1, %c0_i32 : i32
    %c0_i32_0 = arith.constant 0 : i32
    %c0_i32_1 = arith.constant 0 : i32
    %c0_i32_2 = arith.constant 0 : i32
    return %c0_i32_0, %2, %c0_i32_1 : i32, i32, i32
  }
  func.func @transform_1(%arg0: i32, %arg1: i32) -> (i32, i32, i32) {
    %c1_i32 = arith.constant 1 : i32
    %0 = arith.muli %arg0, %c1_i32 : i32
    %1 = arith.addi %0, %arg1 : i32
    %c0_i32 = arith.constant 0 : i32
    %2 = arith.minsi %1, %c0_i32 : i32
    %c0_i32_0 = arith.constant 0 : i32
    %c0_i32_1 = arith.constant 0 : i32
    %c0_i32_2 = arith.constant 0 : i32
    return %c0_i32_0, %2, %c0_i32_1 : i32, i32, i32
  }
  func.func @transform_2(%arg0: i32, %arg1: i32) -> (i32, i32) {
    %c0_i32 = arith.constant 0 : i32
    %c0_i32_0 = arith.constant 0 : i32
    %c0_i32_1 = arith.constant 0 : i32
    return %c0_i32, %c0_i32_0 : i32, i32
  }
  func.func @transform_3(%arg0: i32, %arg1: i32) -> (i32, i32) {
    %c0_i32 = arith.constant 0 : i32
    %c0_i32_0 = arith.constant 0 : i32
    %c0_i32_1 = arith.constant 0 : i32
    return %c0_i32, %c0_i32_0 : i32, i32
  }
  func.func @transform_4(%arg0: i32, %arg1: i32) -> (i32, i32) {
    %c0_i32 = arith.constant 0 : i32
    %c0_i32_0 = arith.constant 0 : i32
    return %c0_i32, %arg0 : i32, i32
  }
}

</mosaic_0001>

<bundles_post_ra>
// kernel: apc_predictor_loss.1
= control target key start
LH: loop header
LB: loop body
LE: loop exit
PB: predicated region body
PF: predicated region fallthrough
CT: control target
= control target key end

     0   :  { %v319_v1 = vmov 0.0   ;;  %vm320_vm0 = vmmov 0   ;;  %s384_s0 = inlined_call_operand.vmem [shape: f32[2,8,16], index: 0, kind: input, shape index: {}]   ;;  %s385_s1 = inlined_call_operand.vmem [shape: f32[2,8,32], index: 1, kind: input, shape index: {}]   ;;  %s386_s2 = inlined_call_operand.vmem [shape: bf16[32,16], index: 2, kind: input, shape index: {}]   ;;  %s387_s3 = inlined_call_operand.vmem [shape: f32[1,16], index: 3, kind: input, shape index: {}]   ;;  %s388_s4 = inlined_call_operand.hbm [shape: f32[1,128], index: 4, kind: output, shape index: {}]  }
   0x1   :  { %v293_v0 = vld [vmem:[%s386_s2] sm:$0xff]   ;;  %272 = vmatprep.subr.bf16.mxu0 %v319_v1  ;;  %280 = vmatprep.subr.bf16.mxu1 %v319_v1  ;;  %v294_v2 = vld [vmem:[%s386_s2 + $0x8] sm:$0xff]  }
   0x2   :  { %273 = vmatpush3.bf16.msra.mxu0 %v293_v0  ;;  %276 = vmatprep.mubr.msk.bf16.mxu0 %vm320_vm0, %v319_v1  ;;  %v91_v3 = vld [vmem:[%s385_s1] sm:$0xff]  ;;  %v263_v4 = vld [vmem:[%s385_s1 + $0x8] sm:$0xff] }
   0x3   :  { %274 = vmatprep.subr.bf16.mxu0 %v319_v1  ;;  %281 = vmatpush3.bf16.msra.mxu1 %v293_v0 }
   0x4   :  { %9 = vsyncpa [#allocation4], 0  ;;  %282 = vmatprep.subr.bf16.mxu1 %v319_v1  ;;  %284 = vmatprep.mubr.msk.bf16.mxu1 %vm320_vm0, %v319_v1  ;;  %v92_v5 = vpack.c.bf16 %v91_v3, %v91_v3  ;;  %vm111_vm1 = vcmask 261120   ;;  %v165_v6 = vpack.c.bf16 %v263_v4, %v263_v4  ;;  %vm78_vm2 = vcmask 130048   ;;  %v259_v8 = vld [vmem:[%s387_s3] ss:$0 sm:$0xff] }
   0x5   :  { %79 = vst.msk [vmem:[#allocation2] sm:$0xff] %vm78_vm2, %v319_v1  ;;  %v80_v7 = vlaneseq  ;;  %v155_v11 = vld [vmem:[%s384_s0] sm:$0xff]  ;;  %v265_v21 = vld [vmem:[%s384_s0 + $0x8] sm:$0xff]  ;;  %s321_s0 = smov [#allocation3]  }
   0x6   :  { %275 = vmatpush3.bf16.msra.mxu0 %v294_v2  ;;  %s239_s3 = sshll.u32 %s321_s0, 4  ;;  %s240_s3 = int_to_ptr.vmem [resolvable:$true] %s239_s3 }
   0x7   :  { %283 = vmatpush3.bf16.msra.mxu1 %v294_v2  ;;  %v81_v9 = vshrl.u32 %v80_v7, 7  ;;  %s295_s28 = scalar_lea.vmem %s240_s3, 16  ;;  %s299_s29 = scalar_lea.vmem %s240_s3, 32 }
   0x8   :  { %p296_p0 = scmp.ne.s32.totalorder %s240_s3, %s295_s28  ;;  %p300_p1 = scmp.lt.s32.totalorder %s240_s3, %s240_s3 }
   0x9   :  { %277 = vmatmul.mubr.msk.bf16.vlgmr.msra.gmra.mrb[0].mxu0 %vm111_vm1, %v92_v5  ;;  %vm85_vm3 = vcmp.lt.s32.totalorder %v81_v9, 6  ;;  %p301_p2 = scmp.lt.s32.totalorder %s299_s29, %s295_s28 }
   0xa   :  { %285 = vmatmul.mubr.msk.bf16.vlgmr.msra.gmra.mrb[0].mxu1 %vm111_vm1, %v165_v6 }
   0xb   :  { %p302_p3 = por %p301_p2, %p300_p1 }
   0xc   :  { %v158_v24 = vld [vmem:[#allocation2] sm:$0xff] }
   0xd   :  { %p303_p4 = pnand %p302_p3, %p296_p0 }
  0xdc   :  { %v149_v10 = vpop.f32.mrb[0].mxu0 }
  0xdd   :  { %v150_v12 = vadd.f32 %v259_v8, %v149_v10  ;;  %v278_v13 = vpop.f32.mrb[1].mxu0  ;;  %v203_v14 = vpop.f32.mrb[0].mxu1 }
  0xde   :  { %v152_v15 = vpop.f32.mrb[2].mxu0  ;;  %v286_v16 = vpop.f32.mrb[1].mxu1  ;;  %v204_v19 = vadd.f32 %v259_v8, %v203_v14 }
  0xdf   :  { %v156_v17 = vsub.f32 %v155_v11, %v150_v12  ;;  %v279_v18 = vpop.f32.mrb[3].mxu0  ;;  %v206_v20 = vpop.f32.mrb[2].mxu1 }
  0xe0   :  { %v287_v22 = vpop.f32.mrb[3].mxu1  ;;  %v211_v26 = vsub.f32 %v265_v21, %v204_v19 }
  0xe1   :  { %v157_v23 = vand.u32 2147483647, %v156_v17 }
  0xe2   :  { %v212_v28 = vand.u32 2147483647, %v211_v26 }
  0xe3   :  { %v159_v25 = vsel %vm85_vm3, %v157_v23, 0.0 }
  0xe4   :  { %v160_v27 = vadd.f32 %v159_v25, %v158_v24  ;;  %v214_v29 = vsel %vm85_vm3, %v212_v28, 0.0 }
  0xe6   :  { %162 = vst.msk [vmem:[#allocation2] sm:$0xff] %vm78_vm2, %v160_v27 }
  0xed   :  { %v213_v30 = vld [vmem:[#allocation2] sm:$0xff] }
  0xee   :  { %v215_v31 = vadd.f32 %v214_v29, %v213_v30 }
  0xf0   :  { %216 = vst.msk [vmem:[#allocation2] sm:$0xff] %vm78_vm2, %v215_v31 }
  0xf7   :  { %v220_v32 = vld [vmem:[#allocation2] sm:$0xff] }
  0xf8   :  { %v221_v33 = vsel %vm78_vm2, %v220_v32, 0.0 }
  0xf9   :  { %222 = vadd.xlane.f32.xlu0 %v221_v33 }
 0x186   :  { %v223_v34 = vpop.xlane.xlu0 %222 }
 0x187   :  { %v224_v35 = vrot.slane %v223_v34, 4 }
 0x189   :  { %v225_v36 = vadd.f32 %v224_v35, %v223_v34 }
 0x18b   :  { %v226_v37 = vrot.slane %v225_v36, 2 }
 0x18d   :  { %v227_v38 = vadd.f32 %v226_v37, %v225_v36 }
 0x18f   :  { %v228_v39 = vrot.slane %v227_v38, 1 }
 0x191   :  { %v229_v40 = vadd.f32 %v228_v39, %v227_v38 }
 0x193   :  { %288 = vpush %v229_v40 }
 0x1c4   :  { %s289_s27 = spop %288 }
 0x1c5   :  { %v231_v41 = vstv %s289_s27 }
 0x1c6   :  { %232 = vst [vmem:[#allocation3] sm:$0x1] %v231_v41 }
 0x1c7   :  { %306 = shalt.err (!%p303_p4)
}
 0x1c8   :  { %s307_s6 = scalar_lea.hbm %s388_s4, 16 }
 0x1c9   :  { %p308_p5 = scmp.ne.s32.totalorder %s388_s4, %s307_s6  ;;  %p311_p6 = scmp.lt.u32.totalorder %s307_s6, %s388_s4 }
 0x1cb   :  { %p313_p7 = pnand %p311_p6, %p308_p5 }
 0x1cd   :  { %316 = shalt.err (!%p313_p7)
}
 0x1ce   :  { %242 = dma.vmem_to_hbm [thread:$0]  %s240_s3, 16, %s388_s4, [#allocation4]  }
 0x1cf   :  { %317 = dma.done.wait [#allocation4], 16  }
 0x1d0   :  { %318 = vsyncadd [#allocation4], 4294967280 }
 0x1d1   :  { %246 = vsyncpa [#allocation4], 1 }

</bundles_post_ra>
